<compile_context>
chip_gen: v5e
topology: v5e:2x2
jax: 0.10.0
libtpu: 0.0.40
codegen_flags: <defaults>
</compile_context>

<pallas_src>
import jax
import jax.numpy as jnp
import numpy as np
from jax.experimental import pallas as pl
from jax.experimental.pallas import tpu as pltpu


def _leaky_relu(x, slope=0.1):
    return jnp.where(x >= 0, x, slope * x)


# ---------------------------------------------------------------------------
# Kernel: amp_fuse and pha_fuse branches (1x1 conv -> LeakyReLU -> 1x1 conv)
# plus the folded-in Nyquist pre-scale.  Blocks are (C, T) with pixels on the
# lane axis; the scale block is (1, T) broadcast over channels (sublanes).
# ---------------------------------------------------------------------------
def fuse_kernel(mag_ref, pha_ref, scale_ref,
                wa1_ref, ba1_ref, wa2_ref, ba2_ref,
                wp1_ref, bp1_ref, wp2_ref, bp2_ref,
                mag_out_ref, pha_out_ref):
    mag = mag_ref[...]                      # (C, T)
    pha = pha_ref[...]                      # (C, T)
    scale = scale_ref[...]                  # (1, T) -> broadcast over sublanes

    m = jnp.dot(wa1_ref[...], mag, preferred_element_type=jnp.float32) + ba1_ref[...]
    m = _leaky_relu(m)
    m = jnp.dot(wa2_ref[...], m, preferred_element_type=jnp.float32) + ba2_ref[...]

    p = jnp.dot(wp1_ref[...], pha, preferred_element_type=jnp.float32) + bp1_ref[...]
    p = _leaky_relu(p)
    p = jnp.dot(wp2_ref[...], p, preferred_element_type=jnp.float32) + bp2_ref[...]

    mag_out_ref[...] = m * scale
    pha_out_ref[...] = p * scale


def _pick_hw_tile(hw, n_batch, c):
    """Lane-dense pixel tile: a multiple of 128 dividing H*W, sized for VMEM."""
    if hw % 128 != 0:
        return hw                                   # full-row block (always legal)
    # ~1 MiB per f32 (C, T) block: ~5 blocked arrays x 2 pipeline buffers stay
    # inside the default scoped-VMEM limit on v5e/v6e/v7x without extra flags.
    target = max(128, ((1 << 20) // (4 * c)) // 128 * 128)
    t = min(target, hw)
    while hw % t != 0:
        t -= 128
    # expose >= 4 grid blocks so both v7x TensorCores get pipelined work
    while n_batch * (hw // t) < 4 and t >= 256 and (t // 2) % 128 == 0:
        t //= 2
    return t


def fuse_pallas(mag, pha, scale, params):
    """mag, pha: (N, C, HW) f32; scale: (1, HW) f32  ->  (Mag, Pha) (N, C, HW)."""
    N, C, HW = mag.shape
    T = _pick_hw_tile(HW, N, C)
    data_spec = pl.BlockSpec((None, C, T), lambda n, t: (n, 0, t))
    scale_spec = pl.BlockSpec((1, T), lambda n, t: (0, t))
    wb_spec = pl.BlockSpec(memory_space=pltpu.MemorySpace.VMEM)  # whole-array resident
    return pl.pallas_call(
        fuse_kernel,
        out_shape=(jax.ShapeDtypeStruct((N, C, HW), jnp.float32),
                   jax.ShapeDtypeStruct((N, C, HW), jnp.float32)),
        grid=(N, HW // T),
        in_specs=[data_spec, data_spec, scale_spec] + [wb_spec] * 8,
        out_specs=(data_spec, data_spec),
        compiler_params=pltpu.CompilerParams(
            dimension_semantics=("parallel", "parallel")),
    )(mag, pha, scale,
      params["wa1"], params["ba1"], params["wa2"], params["ba2"],
      params["wp1"], params["bp1"], params["wp2"], params["bp2"])


def _nyquist_scale(H, W):
    """Lane-wise pre-scale: 0.5 on the (duplicated) Nyquist row/col, 0.25 at
    their intersection, 1 elsewhere.  Applied inside the Pallas kernel; it is
    exactly equivalent to the original post-scatter 0.5 row/col scaling."""
    row = np.ones((H, 1), np.float32)
    col = np.ones((1, W), np.float32)
    if H % 2 == 0:
        row[H // 2, 0] = 0.5
    if W % 2 == 0:
        col[0, W // 2] = 0.5
    return jnp.asarray((row * col).reshape(1, H * W))


def _corner_upsample(S, H, W):
    """Place the four corners of the HxW spectrum S into a 2Hx2W grid (zeros
    elsewhere).  The Nyquist 0.5 scaling is already folded into S by the
    Pallas kernel, so this is pure copy/pad (XLA fuses it with cos/sin)."""
    N, C = S.shape[0], S.shape[1]
    r, c = H, W
    ir1, ir2 = (r // 2 + 1, r // 2 + 1) if r % 2 == 1 else (r // 2 + 1, r // 2)
    ic1, ic2 = (c // 2 + 1, c // 2 + 1) if c % 2 == 1 else (c // 2 + 1, c // 2)
    I = jnp.zeros((N, C, 2 * H, 2 * W), jnp.float32)
    I = I.at[:, :, :ir1, :ic1].set(S[:, :, :ir1, :ic1])
    I = I.at[:, :, :ir1, ic2 + c:].set(S[:, :, :ir1, ic2:])
    I = I.at[:, :, ir2 + r:, :ic1].set(S[:, :, ir2:, :ic1])
    I = I.at[:, :, ir2 + r:, ic2 + c:].set(S[:, :, ir2:, ic2:])
    return I


@jax.jit
def freup_corner_interpolation(x, params):
    N, C, H, W = x.shape

    # TODO(synk): fft2 / ifft2 are complex-valued XLA custom calls with no
    # Pallas TPU equivalent; they and the complex64 glue stay in plain JAX.
    fft_x = jnp.fft.fft2(x)
    mag = jnp.abs(fft_x).astype(jnp.float32)
    pha = jnp.angle(fft_x).astype(jnp.float32)

    # NCHW -> (N, C, H*W) is a free reshape; pixels land on the lane axis.
    Mag, Pha = fuse_pallas(mag.reshape(N, C, H * W),
                           pha.reshape(N, C, H * W),
                           _nyquist_scale(H, W), params)
    Mag = Mag.reshape(N, C, H, W)
    Pha = Pha.reshape(N, C, H, W)

    I_Mup = _corner_upsample(Mag, H, W)
    I_Pup = _corner_upsample(Pha, H, W)
    real = I_Mup * jnp.cos(I_Pup)
    imag = I_Mup * jnp.sin(I_Pup)

    out_c = jnp.fft.ifft2(jax.lax.complex(real, imag))
    return jnp.abs(out_c).astype(jnp.float32)


# ---------------------------------------------------------------------------
# Pure-JAX reference implementing the ORIGINAL torch semantics (post-scatter
# Nyquist scaling, no Pallas) for an in-script sanity check.
# ---------------------------------------------------------------------------
def reference(x, params):
    N, C, H, W = x.shape
    hp = jax.lax.Precision.HIGHEST

    def conv1x1(t, w, b):        # t: NCHW, w: (Cout, Cin), b: (Cout, 1)
        return jnp.einsum("oi,nihw->nohw", w, t, precision=hp) + b.reshape(1, C, 1, 1)

    def corner_up(S):
        r, c = H, W
        ir1, ir2 = (r // 2 + 1, r // 2 + 1) if r % 2 == 1 else (r // 2 + 1, r // 2)
        ic1, ic2 = (c // 2 + 1, c // 2 + 1) if c % 2 == 1 else (c // 2 + 1, c // 2)
        I = jnp.zeros((N, C, 2 * H, 2 * W), jnp.float32)
        I = I.at[:, :, :ir1, :ic1].set(S[:, :, :ir1, :ic1])
        I = I.at[:, :, :ir1, ic2 + c:].set(S[:, :, :ir1, ic2:])
        I = I.at[:, :, ir2 + r:, :ic1].set(S[:, :, ir2:, :ic1])
        I = I.at[:, :, ir2 + r:, ic2 + c:].set(S[:, :, ir2:, ic2:])
        if r % 2 == 0:
            I = I.at[:, :, ir2, :].multiply(0.5)
            I = I.at[:, :, ir2 + r, :].multiply(0.5)
        if c % 2 == 0:
            I = I.at[:, :, :, ic2].multiply(0.5)
            I = I.at[:, :, :, ic2 + c].multiply(0.5)
        return I

    fft_x = jnp.fft.fft2(x)
    mag = jnp.abs(fft_x).astype(jnp.float32)
    pha = jnp.angle(fft_x).astype(jnp.float32)
    Mag = conv1x1(_leaky_relu(conv1x1(mag, params["wa1"], params["ba1"])),
                  params["wa2"], params["ba2"])
    Pha = conv1x1(_leaky_relu(conv1x1(pha, params["wp1"], params["bp1"])),
                  params["wp2"], params["bp2"])
    I_Mup = corner_up(Mag)
    I_Pup = corner_up(Pha)
    out_c = jnp.fft.ifft2(jax.lax.complex(I_Mup * jnp.cos(I_Pup),
                                          I_Mup * jnp.sin(I_Pup)))
    return jnp.abs(out_c).astype(jnp.float32)


if __name__ == "__main__":
    C = 4
    key = jax.random.PRNGKey(0)
    keys = jax.random.split(key, 6)

    def make_conv(k):
        kw, kb = jax.random.split(k)
        # nn.Conv2d(C, C, 1) weight (Cout, Cin, 1, 1) stored as (Cout, Cin);
        # bias stored as (Cout, 1) so it broadcasts over the lane (pixel) axis.
        w = jax.random.normal(kw, (C, C), jnp.float32) * 0.2
        b = jax.random.normal(kb, (C,), jnp.float32).reshape(C, 1) * 0.1
        return w, b

    wa1, ba1 = make_conv(keys[1])
    wa2, ba2 = make_conv(keys[2])
    wp1, bp1 = make_conv(keys[3])
    wp2, bp2 = make_conv(keys[4])
    params = dict(wa1=wa1, ba1=ba1, wa2=wa2, ba2=ba2,
                  wp1=wp1, bp1=bp1, wp2=wp2, bp2=bp2)

    # Even spatial dims (exercises the Nyquist 0.5 path folded into the kernel).
    N, H, W = 2, 16, 16
    x = jax.random.normal(keys[0], (N, C, H, W), jnp.float32)
    out = jax.block_until_ready(freup_corner_interpolation(x, params))
    assert out.shape == (N, C, 2 * H, 2 * W), out.shape
    ref = jax.block_until_ready(reference(x, params))
    np.testing.assert_allclose(np.asarray(out), np.asarray(ref),
                               rtol=2e-2, atol=2e-2)

    # Odd spatial dims (no Nyquist scaling; full-row lane block path).
    N2, H2, W2 = 1, 15, 15
    x2 = jax.random.normal(keys[5], (N2, C, H2, W2), jnp.float32)
    out2 = jax.block_until_ready(freup_corner_interpolation(x2, params))
    assert out2.shape == (N2, C, 2 * H2, 2 * W2), out2.shape
    ref2 = jax.block_until_ready(reference(x2, params))
    np.testing.assert_allclose(np.asarray(out2), np.asarray(ref2),
                               rtol=2e-2, atol=2e-2)

    print("KERNEL_OK")
</pallas_src>

<mosaic_0001>
module attributes {stable_mosaic.version = 11 : i64} {
  func.func @fuse_kernel(%arg0: i32, %arg1: i32, %arg2: memref<1x4x128xf32, #tpu.memory_space<vmem>>, %arg3: memref<1x4x128xf32, #tpu.memory_space<vmem>>, %arg4: memref<1x128xf32, #tpu.memory_space<vmem>>, %arg5: memref<4x4xf32, #tpu.memory_space<vmem>>, %arg6: memref<4x1xf32, #tpu.memory_space<vmem>>, %arg7: memref<4x4xf32, #tpu.memory_space<vmem>>, %arg8: memref<4x1xf32, #tpu.memory_space<vmem>>, %arg9: memref<4x4xf32, #tpu.memory_space<vmem>>, %arg10: memref<4x1xf32, #tpu.memory_space<vmem>>, %arg11: memref<4x4xf32, #tpu.memory_space<vmem>>, %arg12: memref<4x1xf32, #tpu.memory_space<vmem>>, %arg13: memref<1x4x128xf32, #tpu.memory_space<vmem>>, %arg14: memref<1x4x128xf32, #tpu.memory_space<vmem>>) attributes {dimension_semantics = [#tpu.dimension_semantics<parallel>, #tpu.dimension_semantics<parallel>], iteration_bounds = array<i64: 2, 2>, scalar_prefetch = 0 : i64, scratch_operands = 0 : i64, tpu.core_type = #tpu.core_type<tc>, window_params = [{transform_indices = @transform_0, window_bounds = array<i64: 1, 4, 128>}, {transform_indices = @transform_1, window_bounds = array<i64: 1, 4, 128>}, {transform_indices = @transform_2, window_bounds = array<i64: 1, 128>}, {pipeline_mode = #tpu.pipeline_mode<synchronous>, transform_indices = @transform_3, window_bounds = array<i64: 4, 4>}, {pipeline_mode = #tpu.pipeline_mode<synchronous>, transform_indices = @transform_4, window_bounds = array<i64: 4, 1>}, {pipeline_mode = #tpu.pipeline_mode<synchronous>, transform_indices = @transform_5, window_bounds = array<i64: 4, 4>}, {pipeline_mode = #tpu.pipeline_mode<synchronous>, transform_indices = @transform_6, window_bounds = array<i64: 4, 1>}, {pipeline_mode = #tpu.pipeline_mode<synchronous>, transform_indices = @transform_7, window_bounds = array<i64: 4, 4>}, {pipeline_mode = #tpu.pipeline_mode<synchronous>, transform_indices = @transform_8, window_bounds = array<i64: 4, 1>}, {pipeline_mode = #tpu.pipeline_mode<synchronous>, transform_indices = @transform_9, window_bounds = array<i64: 4, 4>}, {pipeline_mode = #tpu.pipeline_mode<synchronous>, transform_indices = @transform_10, window_bounds = array<i64: 4, 1>}, {transform_indices = @transform_11, window_bounds = array<i64: 1, 4, 128>}, {transform_indices = @transform_12, window_bounds = array<i64: 1, 4, 128>}]} {
    %c0 = arith.constant 0 : index
    %c0_0 = arith.constant 0 : index
    %c0_1 = arith.constant 0 : index
    %0 = vector.load %arg2[%c0, %c0_0, %c0_1] : memref<1x4x128xf32, #tpu.memory_space<vmem>>, vector<1x4x128xf32>
    %1 = vector.shape_cast %0 : vector<1x4x128xf32> to vector<4x128xf32>
    %c0_2 = arith.constant 0 : index
    %c0_3 = arith.constant 0 : index
    %c0_4 = arith.constant 0 : index
    %2 = vector.load %arg3[%c0_2, %c0_3, %c0_4] : memref<1x4x128xf32, #tpu.memory_space<vmem>>, vector<1x4x128xf32>
    %3 = vector.shape_cast %2 : vector<1x4x128xf32> to vector<4x128xf32>
    %c0_5 = arith.constant 0 : index
    %c0_6 = arith.constant 0 : index
    %4 = vector.load %arg4[%c0_5, %c0_6] : memref<1x128xf32, #tpu.memory_space<vmem>>, vector<1x128xf32>
    %c0_7 = arith.constant 0 : index
    %c0_8 = arith.constant 0 : index
    %5 = vector.load %arg5[%c0_7, %c0_8] : memref<4x4xf32, #tpu.memory_space<vmem>>, vector<4x4xf32>
    %cst = arith.constant dense<0.000000e+00> : vector<4x128xf32>
    %6 = tpu.matmul %5, %1, %cst {dimension_numbers = #tpu.dot_dimension_numbers<[1], [0], [0], [1], [0, 0, 1, 1], [], []>} : vector<4x4xf32>, vector<4x128xf32>, vector<4x128xf32> -> vector<4x128xf32>
    %c0_9 = arith.constant 0 : index
    %c0_10 = arith.constant 0 : index
    %7 = vector.load %arg6[%c0_9, %c0_10] : memref<4x1xf32, #tpu.memory_space<vmem>>, vector<4x1xf32>
    %8 = vector.broadcast %7 : vector<4x1xf32> to vector<4x128xf32>
    %9 = arith.addf %6, %8 : vector<4x128xf32>
    %cst_11 = arith.constant 0.000000e+00 : f32
    %10 = vector.broadcast %cst_11 : f32 to vector<4x128xf32>
    %11 = arith.cmpf oge, %9, %10 : vector<4x128xf32>
    %cst_12 = arith.constant 1.000000e-01 : f32
    %12 = vector.broadcast %cst_12 : f32 to vector<4x128xf32>
    %13 = arith.mulf %12, %9 : vector<4x128xf32>
    %14 = arith.select %11, %9, %13 : vector<4x128xi1>, vector<4x128xf32>
    %c0_13 = arith.constant 0 : index
    %c0_14 = arith.constant 0 : index
    %15 = vector.load %arg7[%c0_13, %c0_14] : memref<4x4xf32, #tpu.memory_space<vmem>>, vector<4x4xf32>
    %cst_15 = arith.constant dense<0.000000e+00> : vector<4x128xf32>
    %16 = tpu.matmul %15, %14, %cst_15 {dimension_numbers = #tpu.dot_dimension_numbers<[1], [0], [0], [1], [0, 0, 1, 1], [], []>} : vector<4x4xf32>, vector<4x128xf32>, vector<4x128xf32> -> vector<4x128xf32>
    %c0_16 = arith.constant 0 : index
    %c0_17 = arith.constant 0 : index
    %17 = vector.load %arg8[%c0_16, %c0_17] : memref<4x1xf32, #tpu.memory_space<vmem>>, vector<4x1xf32>
    %18 = vector.broadcast %17 : vector<4x1xf32> to vector<4x128xf32>
    %19 = arith.addf %16, %18 : vector<4x128xf32>
    %c0_18 = arith.constant 0 : index
    %c0_19 = arith.constant 0 : index
    %20 = vector.load %arg9[%c0_18, %c0_19] : memref<4x4xf32, #tpu.memory_space<vmem>>, vector<4x4xf32>
    %cst_20 = arith.constant dense<0.000000e+00> : vector<4x128xf32>
    %21 = tpu.matmul %20, %3, %cst_20 {dimension_numbers = #tpu.dot_dimension_numbers<[1], [0], [0], [1], [0, 0, 1, 1], [], []>} : vector<4x4xf32>, vector<4x128xf32>, vector<4x128xf32> -> vector<4x128xf32>
    %c0_21 = arith.constant 0 : index
    %c0_22 = arith.constant 0 : index
    %22 = vector.load %arg10[%c0_21, %c0_22] : memref<4x1xf32, #tpu.memory_space<vmem>>, vector<4x1xf32>
    %23 = vector.broadcast %22 : vector<4x1xf32> to vector<4x128xf32>
    %24 = arith.addf %21, %23 : vector<4x128xf32>
    %cst_23 = arith.constant 0.000000e+00 : f32
    %25 = vector.broadcast %cst_23 : f32 to vector<4x128xf32>
    %26 = arith.cmpf oge, %24, %25 : vector<4x128xf32>
    %cst_24 = arith.constant 1.000000e-01 : f32
    %27 = vector.broadcast %cst_24 : f32 to vector<4x128xf32>
    %28 = arith.mulf %27, %24 : vector<4x128xf32>
    %29 = arith.select %26, %24, %28 : vector<4x128xi1>, vector<4x128xf32>
    %c0_25 = arith.constant 0 : index
    %c0_26 = arith.constant 0 : index
    %30 = vector.load %arg11[%c0_25, %c0_26] : memref<4x4xf32, #tpu.memory_space<vmem>>, vector<4x4xf32>
    %cst_27 = arith.constant dense<0.000000e+00> : vector<4x128xf32>
    %31 = tpu.matmul %30, %29, %cst_27 {dimension_numbers = #tpu.dot_dimension_numbers<[1], [0], [0], [1], [0, 0, 1, 1], [], []>} : vector<4x4xf32>, vector<4x128xf32>, vector<4x128xf32> -> vector<4x128xf32>
    %c0_28 = arith.constant 0 : index
    %c0_29 = arith.constant 0 : index
    %32 = vector.load %arg12[%c0_28, %c0_29] : memref<4x1xf32, #tpu.memory_space<vmem>>, vector<4x1xf32>
    %33 = vector.broadcast %32 : vector<4x1xf32> to vector<4x128xf32>
    %34 = arith.addf %31, %33 : vector<4x128xf32>
    %35 = vector.broadcast %4 : vector<1x128xf32> to vector<4x128xf32>
    %36 = arith.mulf %19, %35 : vector<4x128xf32>
    %c0_30 = arith.constant 0 : index
    %c0_31 = arith.constant 0 : index
    %c0_32 = arith.constant 0 : index
    %37 = vector.load %arg13[%c0_30, %c0_31, %c0_32] : memref<1x4x128xf32, #tpu.memory_space<vmem>>, vector<1x4x128xf32>
    %38 = vector.shape_cast %37 : vector<1x4x128xf32> to vector<4x128xf32>
    %39 = vector.shape_cast %36 : vector<4x128xf32> to vector<1x4x128xf32>
    tpu.vector_store %arg13[%c0_30, %c0_31, %c0_32], %39 {strides = array<i32>} : memref<1x4x128xf32, #tpu.memory_space<vmem>>, vector<1x4x128xf32>,
    %40 = vector.broadcast %4 : vector<1x128xf32> to vector<4x128xf32>
    %41 = arith.mulf %34, %40 : vector<4x128xf32>
    %c0_33 = arith.constant 0 : index
    %c0_34 = arith.constant 0 : index
    %c0_35 = arith.constant 0 : index
    %42 = vector.load %arg14[%c0_33, %c0_34, %c0_35] : memref<1x4x128xf32, #tpu.memory_space<vmem>>, vector<1x4x128xf32>
    %43 = vector.shape_cast %42 : vector<1x4x128xf32> to vector<4x128xf32>
    %44 = vector.shape_cast %41 : vector<4x128xf32> to vector<1x4x128xf32>
    tpu.vector_store %arg14[%c0_33, %c0_34, %c0_35], %44 {strides = array<i32>} : memref<1x4x128xf32, #tpu.memory_space<vmem>>, vector<1x4x128xf32>,
    return
  }
  func.func @transform_0(%arg0: i32, %arg1: i32) -> (i32, i32, i32) {
    %c0_i32 = arith.constant 0 : i32
    %c0_i32_0 = arith.constant 0 : i32
    return %arg0, %c0_i32, %arg1 : i32, i32, i32
  }
  func.func @transform_1(%arg0: i32, %arg1: i32) -> (i32, i32, i32) {
    %c0_i32 = arith.constant 0 : i32
    %c0_i32_0 = arith.constant 0 : i32
    return %arg0, %c0_i32, %arg1 : i32, i32, i32
  }
  func.func @transform_2(%arg0: i32, %arg1: i32) -> (i32, i32) {
    %c0_i32 = arith.constant 0 : i32
    %c0_i32_0 = arith.constant 0 : i32
    return %c0_i32, %arg1 : i32, i32
  }
  func.func @transform_3(%arg0: i32, %arg1: i32) -> (i32, i32) {
    %c0_i32 = arith.constant 0 : i32
    %c0_i32_0 = arith.constant 0 : i32
    %c0_i32_1 = arith.constant 0 : i32
    return %c0_i32, %c0_i32_0 : i32, i32
  }
  func.func @transform_4(%arg0: i32, %arg1: i32) -> (i32, i32) {
    %c0_i32 = arith.constant 0 : i32
    %c0_i32_0 = arith.constant 0 : i32
    %c0_i32_1 = arith.constant 0 : i32
    return %c0_i32, %c0_i32_0 : i32, i32
  }
  func.func @transform_5(%arg0: i32, %arg1: i32) -> (i32, i32) {
    %c0_i32 = arith.constant 0 : i32
    %c0_i32_0 = arith.constant 0 : i32
    %c0_i32_1 = arith.constant 0 : i32
    return %c0_i32, %c0_i32_0 : i32, i32
  }
  func.func @transform_6(%arg0: i32, %arg1: i32) -> (i32, i32) {
    %c0_i32 = arith.constant 0 : i32
    %c0_i32_0 = arith.constant 0 : i32
    %c0_i32_1 = arith.constant 0 : i32
    return %c0_i32, %c0_i32_0 : i32, i32
  }
  func.func @transform_7(%arg0: i32, %arg1: i32) -> (i32, i32) {
    %c0_i32 = arith.constant 0 : i32
    %c0_i32_0 = arith.constant 0 : i32
    %c0_i32_1 = arith.constant 0 : i32
    return %c0_i32, %c0_i32_0 : i32, i32
  }
  func.func @transform_8(%arg0: i32, %arg1: i32) -> (i32, i32) {
    %c0_i32 = arith.constant 0 : i32
    %c0_i32_0 = arith.constant 0 : i32
    %c0_i32_1 = arith.constant 0 : i32
    return %c0_i32, %c0_i32_0 : i32, i32
  }
  func.func @transform_9(%arg0: i32, %arg1: i32) -> (i32, i32) {
    %c0_i32 = arith.constant 0 : i32
    %c0_i32_0 = arith.constant 0 : i32
    %c0_i32_1 = arith.constant 0 : i32
    return %c0_i32, %c0_i32_0 : i32, i32
  }
  func.func @transform_10(%arg0: i32, %arg1: i32) -> (i32, i32) {
    %c0_i32 = arith.constant 0 : i32
    %c0_i32_0 = arith.constant 0 : i32
    %c0_i32_1 = arith.constant 0 : i32
    return %c0_i32, %c0_i32_0 : i32, i32
  }
  func.func @transform_11(%arg0: i32, %arg1: i32) -> (i32, i32, i32) {
    %c0_i32 = arith.constant 0 : i32
    %c0_i32_0 = arith.constant 0 : i32
    return %arg0, %c0_i32, %arg1 : i32, i32, i32
  }
  func.func @transform_12(%arg0: i32, %arg1: i32) -> (i32, i32, i32) {
    %c0_i32 = arith.constant 0 : i32
    %c0_i32_0 = arith.constant 0 : i32
    return %arg0, %c0_i32, %arg1 : i32, i32, i32
  }
}

</mosaic_0001>

<bundles_post_ra>
// kernel: freup_corner_interpolation.1
= control target key start
LH: loop header
LB: loop body
LE: loop exit
PB: predicated region body
PF: predicated region fallthrough
CT: control target
= control target key end

     0   :  { %s994_s21 = smov 0   ;;  %s996_s22 = smov 0   ;;  %s1096_s0 = inlined_call_operand.vmem [shape: f32[2,4,256], index: 0, kind: input, shape index: {}]   ;;  %s1097_s1 = inlined_call_operand.vmem [shape: f32[2,4,256], index: 1, kind: input, shape index: {}]   ;;  %s1098_s2 = inlined_call_operand.vmem [shape: f32[1,256], index: 2, kind: input, shape index: {}]   ;;  %s1099_s3 = inlined_call_operand.vmem [shape: f32[4,4], index: 3, kind: input, shape index: {}]   ;;  %s1100_s4 = inlined_call_operand.vmem [shape: f32[4,1], index: 4, kind: input, shape index: {}]   ;;  %s1101_s5 = inlined_call_operand.vmem [shape: f32[4,4], index: 5, kind: input, shape index: {}]   ;;  %s1102_s6 = inlined_call_operand.vmem [shape: f32[4,1], index: 6, kind: input, shape index: {}]   ;;  %s1103_s7 = inlined_call_operand.vmem [shape: f32[4,4], index: 7, kind: input, shape index: {}]   ;;  %s1104_s8 = inlined_call_operand.vmem [shape: f32[4,1], index: 8, kind: input, shape index: {}]   ;;  %s1105_s9 = inlined_call_operand.vmem [shape: f32[4,4], index: 9, kind: input, shape index: {}]   ;;  %s1106_s10 = inlined_call_operand.vmem [shape: f32[4,1], index: 10, kind: input, shape index: {}]   ;;  %s1107_s11 = inlined_call_operand.vmem [shape: f32[2,4,256], index: 11, kind: output, shape index: {0}]   ;;  %s1108_s12 = inlined_call_operand.vmem [shape: f32[2,4,256], index: 12, kind: output, shape index: {1}]  }
   0x1   :  { %1109 = sst [smem:[#allocation2_spill]] %s1104_s8  ;;  %s998_s23 = smov 0  }
   0x2   :  { %s1000_s24 = smov 0   ;;  %s1002_s25 = smov 0  }
   0x3 LB: > { %s32_s26 = sadd.s32 1, %s918_s23  ;;  %s35_s27 = sadd.s32 1, %s922_s24  ;;  %s926_s25 = sphi %s1002_s25, %s23_s25   ;;  %s922_s24 = sphi %s1000_s24, %s1114_s24   ;;  %s918_s23 = sphi %s998_s23, %s1113_s23   ;;  %s914_s22 = sphi %s996_s22, %s1112_s22   ;;  %s910_s21 = sphi %s994_s21, %s1111_s21  }
   0x4   : > { %p33_p0 = scmp.ge.s32.totalorder %s32_s26, 2  ;;  %p825_p1 = scmp.ge.s32.totalorder %s926_s25, 1 }
   0x5   : > { %p409_p2 = scmp.lt.s32.totalorder %s926_s25, 5 }
   0x6   : > { %s1116_s26 = smov (%p33_p0, %s32_s26), 0  ;;  %s1118_s27 = smov (!%p33_p0, %s35_s27), %s922_s24 }
   0x7   : > { %p410_p3 = pnand %p825_p1, %p409_p2  ;;  %p37_p4 = scmp.ge.s32.totalorder %s1118_s27, 2 }
   0x8   : > { %p476_p5 = scmp.lt.s32.totalorder (!%p410_p3), %s914_s22, 1  ;;  %p478_p6 = scmp.lt.s32.totalorder (!%p410_p3), %s910_s21, 1 }
   0x9   : > { %s1120_s27 = smov (%p37_p4, %s1118_s27), 0  ;;  %413 = sbr.rel (%p410_p3) target bundleno = 296 (0x128), region = 64 }
   0xa   : > { %s1110_s8 = sld [smem:[#allocation2_spill]] (!%p410_p3) }
   0xe   : > { %s1122_s22 = smov (!%p476_p5, %s914_s22), 1  ;;  %v928_v1 = vmov 0   ;;  %s1124_s21 = smov (!%p478_p6, %s910_s21), 1  ;;  %vm525_vm0 = vcmask 1043456   ;;  %vm521_vm1 = vcmask 31744  }
   0xf   : > { %885 = vset.pattern.permute.xlu0 %v928_v1  ;;  %886 = vset.pattern.permute.xlu1 %v928_v1  ;;  %s826_s30 = sshll.u32 %s1122_s22, 1  ;;  %v585_v2 = vld [vmem:[%s1103_s7] sm:$0xf]  ;;  %s494_s18 = scalar_lea.vmem %s1098_s2, %s1124_s21 }
  0x10   : > { %v586_v0 = vld [vmem:[%s1110_s8] sm:$0xf]  ;;  %s481_s13 = sadd.s32 %s826_s30, %s1124_s21 }
  0x11   : > { %589 = vperm.xlu0 %885, %v586_v0   ;;  %s1030_s14 = sshll.u32 %s481_s13, 2  ;;  %v514_v3 = vld [vmem:[%s1099_s3] sm:$0xf] }
  0x12   : > { %s491_s17 = scalar_lea.vmem %s1097_s1, %s1030_s14  ;;  %s483_s22 = scalar_lea.vmem %s1096_s0, %s1030_s14  ;;  %v515_v6 = vld [vmem:[%s1100_s4] sm:$0xf] }
  0x13   : > { %v512_v4 = vld [vmem:[%s491_s17] sm:$0xf]  ;;  %s502_s15 = scalar_lea.vmem %s1107_s11, %s1030_s14  ;;  %s510_s17 = scalar_lea.vmem %s1108_s12, %s1030_s14 }
  0x14   : > { %v511_v5 = vld [vmem:[%s483_s22] sm:$0xf]  ;;  %838 = vmatpush.msk.msra.mxu2 %vm525_vm0, %v512_v4 }
  0x15   : > { %834 = vmatpush.msk.msra.mxu0 %vm525_vm0, %v511_v5  ;;  %839 = vmatmul.msk.f32.vlgmr.msra.gmra.mxu2 %vm521_vm1, %v585_v2  ;;  %v553_v7 = vld [vmem:[%s1102_s6] sm:$0xf] }
  0x16   : > { %835 = vmatmul.msk.f32.vlgmr.msra.gmra.mxu0 %vm521_vm1, %v514_v3  ;;  %556 = vperm.xlu1 %886, %v553_v7   ;;  %v622_v8 = vld [vmem:[%s1106_s10] sm:$0xf] }
  0x17   : > { %v552_v14 = vld [vmem:[%s1101_s5] sm:$0xf] }
  0x18   : > { %v621_v19 = vld [vmem:[%s1105_s9] sm:$0xf] }
  0x19   : > { %518 = vperm.xlu0 %885, %v515_v6   ;;  %v887_v21 = vld [vmem:[%s494_s18] ss:$0 sm:$0xff] }
  0x1e   : > { %625 = vperm.xlu1 %886, %v622_v8  }
  0x83   : > { %v590_v9 = vpop.permute.xlu0 %589 }
  0x88   : > { %v557_v22 = vpop.permute.xlu1 %556 }
  0x8b   : > { %v519_v10 = vpop.permute.xlu0 %518 }
  0x90   : > { %v626_v26 = vpop.permute.xlu1 %625 }
  0x93   : > { %v546_v11 = vpop.f32.mrf.mxu0 }
  0x94   : > { %v547_v12 = vadd.f32 %v546_v11, %v519_v10 }
  0x96   : > { %vm549_vm2 = vcmp.ge.f32.partialorder %v547_v12, 0.0  ;;  %v550_v13 = vmul.f32 0.1, %v547_v12 }
  0x98   : > { %v551_v15 = vsel %vm549_vm2, %v547_v12, %v550_v13  ;;  %v615_v16 = vpop.f32.mrf.mxu2 }
  0x99   : > { %836 = vmatpush.msk.msra.mxu1 %vm525_vm0, %v551_v15  ;;  %v616_v17 = vadd.f32 %v615_v16, %v590_v9 }
  0x9a   : > { %837 = vmatmul.msk.f32.vlgmr.msra.gmra.mxu1 %vm521_vm1, %v552_v14 }
  0x9b   : > { %vm618_vm3 = vcmp.ge.f32.partialorder %v616_v17, 0.0  ;;  %v619_v18 = vmul.f32 0.1, %v616_v17 }
  0x9d   : > { %v620_v20 = vsel %vm618_vm3, %v616_v17, %v619_v18 }
  0x9e   : > { %840 = vmatpush.msk.msra.mxu3 %vm525_vm0, %v620_v20 }
  0x9f   : > { %841 = vmatmul.msk.f32.vlgmr.msra.gmra.mxu3 %vm521_vm1, %v621_v19 }
 0x117   : > { %v582_v23 = vpop.f32.mrf.mxu1 }
 0x118   : > { %v583_v24 = vadd.f32 %v582_v23, %v557_v22 }
 0x11a   : > { %v657_v25 = vmul.f32 %v887_v21, %v583_v24 }
 0x11c   : > { %658 = vst [vmem:[%s502_s15] sm:$0xf] %v657_v25 }
 0x122   : > { %v651_v27 = vpop.f32.mrf.mxu3 }
 0x123   : > { %v652_v28 = vadd.f32 %v651_v27, %v626_v26 }
 0x125   : > { %v659_v29 = vmul.f32 %v887_v21, %v652_v28 }
 0x127   : > { %660 = vst [vmem:[%s510_s17] sm:$0xf] %v659_v29 }
 0x128 PF: > { %s23_s25 = sadd.s32 1, %s926_s25   ;;  %s1111_s21 = smov %s918_s23 }
 0x129   : > { %p20_p7 = scmp.ge.s32.totalorder %s23_s25, 6   ;;  %s1112_s22 = smov %s922_s24 }
 0x12a   : > { %s1113_s23 = smov %s1116_s26  ;;  %s1114_s24 = smov %s1120_s27 }
 0x12b   :  { %22 = sbr.rel (!%p20_p7) target bundleno = 3 (0x3), region = 112 }

</bundles_post_ra>
